<compile_context>
chip_gen: v5e
topology: v5e:2x2
jax: 0.10.0
libtpu: 0.0.40
codegen_flags: <defaults>
</compile_context>

<pallas_src>
import functools
import math

import jax
import jax.numpy as jnp
from jax.experimental import pallas as pl
from jax.experimental.pallas import tpu as pltpu


def _round_up(x, m):
    return ((x + m - 1) // m) * m


def _pick_tile(total, target, granule=8):
    """Largest divisor of `total` that is <= target and a multiple of `granule`.

    Falls back to `total` (no tiling along that axis) when no such divisor
    exists, which always satisfies the (8,128) BlockSpec rule.
    """
    if total <= target:
        return total
    for t in range(min(total, target), granule - 1, -1):
        if total % t == 0 and t % granule == 0:
            return t
    return total


def _mean_pool_kernel(seq_ref, seqe_ref, src_ref,
                      w1s_ref, w1e_ref, w1b_ref, b1_ref, w2_ref, b2_ref,
                      out_ref, acc_s_ref, acc_e_ref, *, inv_n):
    n_idx = pl.program_id(1)

    @pl.when(n_idx == 0)
    def _():
        acc_s_ref[...] = jnp.zeros_like(acc_s_ref)
        acc_e_ref[...] = jnp.zeros_like(acc_e_ref)

    # Running f32 sum over the sequence axis for this B tile.
    acc_s_ref[...] += jnp.sum(seq_ref[...].astype(jnp.float32), axis=1)
    acc_e_ref[...] += jnp.sum(seqe_ref[...].astype(jnp.float32), axis=1)

    @pl.when(n_idx == pl.num_programs(1) - 1)
    def _():
        hn_s = acc_s_ref[...] * inv_n                 # mean(seq)   [TB, feat]
        hn_e = acc_e_ref[...] * inv_n                 # mean(seq_e) [TB, edge]
        src = src_ref[...].astype(jnp.float32)        # [TB, feat]
        # fc1: concat(hn, src) @ W1^T + b1  ==  hn_s@W1s + hn_e@W1e + src@W1src + b1
        h = (jnp.dot(hn_s, w1s_ref[...], preferred_element_type=jnp.float32)
             + jnp.dot(hn_e, w1e_ref[...], preferred_element_type=jnp.float32)
             + jnp.dot(src, w1b_ref[...], preferred_element_type=jnp.float32)
             + b1_ref[...])
        h = jnp.maximum(h, 0.0)                       # ReLU (padded cols stay 0)
        out = jnp.dot(h, w2_ref[...], preferred_element_type=jnp.float32) + b2_ref[...]
        out_ref[...] = out.astype(out_ref.dtype)      # [TB, F_pad] lane-dense store


def prepare_params(params, feat_dim, edge_dim, lane=128):
    """One-time param preprocessing: transpose + split fc1, pad out-dim to 128 lanes."""
    w1, b1, w2, b2 = params["w1"], params["b1"], params["w2"], params["b2"]
    d_seq, d_edge, f = feat_dim, edge_dim, feat_dim
    d1 = d_seq + d_edge
    f_pad = _round_up(f, lane)
    pad = f_pad - f

    w1t = jnp.pad(w1.T, ((0, 0), (0, pad)))           # [d1 + f, f_pad]
    w2t = jnp.pad(w2.T, ((0, pad), (0, pad)))         # [f_pad, f_pad] (zero rows/cols)
    return {
        "w1_seq": w1t[:d_seq],                        # [feat, f_pad]
        "w1_edge": w1t[d_seq:d1],                     # [edge, f_pad]
        "w1_src": w1t[d1:],                           # [feat, f_pad]
        "b1": jnp.pad(b1, (0, pad)).reshape(1, f_pad),
        "w2": w2t,
        "b2": jnp.pad(b2, (0, pad)).reshape(1, f_pad),
        "feat_dim": f,
        "f_pad": f_pad,
    }


def mean_pool_forward(src, src_t, seq, seq_t, seq_e, mask, prep):
    """Pallas implementation of MeanPool.forward. Returns (output, None)."""
    del src_t, seq_t, mask  # unused by the PyTorch forward
    B, N, d_seq = seq.shape
    d_edge = seq_e.shape[-1]
    f = prep["feat_dim"]
    f_pad = prep["f_pad"]
    itemsize = jnp.dtype(seq.dtype).itemsize

    # B tile: target the 256-row MXU granule (clamps for small B).
    tb = _pick_tile(B, 256)
    # N tile: keep one (seq + seq_e) slab under ~6 MiB so double-buffering of
    # both streamed inputs stays well inside a 32 MiB scoped VMEM (v7x-safe).
    budget = 6 * 1024 * 1024
    rows = max(1, budget // max(1, tb * (d_seq + d_edge) * itemsize))
    tn = _pick_tile(N, rows)

    grid = (B // tb, N // tn)
    kernel = functools.partial(_mean_pool_kernel, inv_n=1.0 / N)

    out_padded = pl.pallas_call(
        kernel,
        out_shape=jax.ShapeDtypeStruct((B, f_pad), src.dtype),
        grid_spec=pltpu.PrefetchScalarGridSpec(
            num_scalar_prefetch=0,
            grid=grid,
            in_specs=[
                pl.BlockSpec((tb, tn, d_seq), lambda b, n: (b, n, 0)),   # seq
                pl.BlockSpec((tb, tn, d_edge), lambda b, n: (b, n, 0)),  # seq_e
                pl.BlockSpec((tb, f), lambda b, n: (b, 0)),              # src
                pl.BlockSpec((d_seq, f_pad), lambda b, n: (0, 0)),       # W1 seq part
                pl.BlockSpec((d_edge, f_pad), lambda b, n: (0, 0)),      # W1 edge part
                pl.BlockSpec((f, f_pad), lambda b, n: (0, 0)),           # W1 src part
                pl.BlockSpec((1, f_pad), lambda b, n: (0, 0)),           # b1
                pl.BlockSpec((f_pad, f_pad), lambda b, n: (0, 0)),       # W2
                pl.BlockSpec((1, f_pad), lambda b, n: (0, 0)),           # b2
            ],
            out_specs=pl.BlockSpec((tb, f_pad), lambda b, n: (b, 0)),
            scratch_shapes=[
                pltpu.VMEM((tb, d_seq), jnp.float32),   # running sum of seq
                pltpu.VMEM((tb, d_edge), jnp.float32),  # running sum of seq_e
            ],
        ),
        compiler_params=pltpu.CompilerParams(
            dimension_semantics=("parallel", "arbitrary"),
            vmem_limit_bytes=32 * 1024 * 1024,
        ),
    )(seq, seq_e, src,
      prep["w1_seq"], prep["w1_edge"], prep["w1_src"],
      prep["b1"], prep["w2"], prep["b2"])

    return out_padded[:, :f], None


def init_params(key, feat_dim, edge_dim, dtype=jnp.float32):
    """Deterministic xavier-normal weights / zero biases (matches __init__ shapes)."""
    d_in1 = (edge_dim + feat_dim) + feat_dim   # fc1: Linear(dim1 + dim2, dim3)
    d_out1 = feat_dim
    d_in2 = feat_dim                           # fc2: Linear(dim3, dim4)
    d_out2 = feat_dim
    k1, k2 = jax.random.split(key)
    std1 = math.sqrt(2.0 / (d_in1 + d_out1))
    std2 = math.sqrt(2.0 / (d_in2 + d_out2))
    return {
        "w1": (jax.random.normal(k1, (d_out1, d_in1)) * std1).astype(dtype),
        "b1": jnp.zeros((d_out1,), dtype),
        "w2": (jax.random.normal(k2, (d_out2, d_in2)) * std2).astype(dtype),
        "b2": jnp.zeros((d_out2,), dtype),
    }


def _reference_forward(src, seq, seq_e, params):
    """Pure-JAX reference (mirrors the PyTorch code) for correctness checking."""
    seq_x = jnp.concatenate([seq, seq_e], axis=2)
    hn = seq_x.mean(axis=1)
    x = jnp.concatenate([hn, src], axis=1)
    h = jax.nn.relu(x @ params["w1"].T + params["b1"])
    return h @ params["w2"].T + params["b2"]


if __name__ == "__main__":
    B, N = 2, 8
    feat_dim, edge_dim = 32, 32

    key = jax.random.PRNGKey(0)
    k_src, k_seq, k_seqe, k_param = jax.random.split(key, 4)

    src = jax.random.normal(k_src, (B, feat_dim), jnp.float32)
    src_t = jax.random.normal(k_src, (B, 1), jnp.float32)          # unused
    seq = jax.random.normal(k_seq, (B, N, feat_dim), jnp.float32)
    seq_t = jax.random.normal(k_seq, (B, N, 1), jnp.float32)       # unused
    seq_e = jax.random.normal(k_seqe, (B, N, edge_dim), jnp.float32)
    mask = jnp.zeros((B, N), jnp.float32)                           # unused

    params = init_params(k_param, feat_dim, edge_dim)
    prep = prepare_params(params, feat_dim, edge_dim)  # hoisted, once per params

    out, aux = mean_pool_forward(src, src_t, seq, seq_t, seq_e, mask, prep)
    out = jax.block_until_ready(out)
    assert aux is None
    assert out.shape == (B, feat_dim)

    ref = _reference_forward(src, seq, seq_e, params)
    assert jnp.allclose(out, ref, atol=1e-5, rtol=1e-5)

    print("KERNEL_OK")
</pallas_src>

<mosaic_0001>
module attributes {stable_mosaic.version = 11 : i64} {
  func.func @_mean_pool_kernel(%arg0: i32, %arg1: i32, %arg2: memref<2x8x32xf32, #tpu.memory_space<vmem>>, %arg3: memref<2x8x32xf32, #tpu.memory_space<vmem>>, %arg4: memref<2x32xf32, #tpu.memory_space<vmem>>, %arg5: memref<32x128xf32, #tpu.memory_space<vmem>>, %arg6: memref<32x128xf32, #tpu.memory_space<vmem>>, %arg7: memref<32x128xf32, #tpu.memory_space<vmem>>, %arg8: memref<1x128xf32, #tpu.memory_space<vmem>>, %arg9: memref<128x128xf32, #tpu.memory_space<vmem>>, %arg10: memref<1x128xf32, #tpu.memory_space<vmem>>, %arg11: memref<2x128xf32, #tpu.memory_space<vmem>>, %arg12: memref<2x32xf32, #tpu.memory_space<vmem>>, %arg13: memref<2x32xf32, #tpu.memory_space<vmem>>) attributes {dimension_semantics = [#tpu.dimension_semantics<parallel>, #tpu.dimension_semantics<arbitrary>], iteration_bounds = array<i64: 1, 1>, scalar_prefetch = 0 : i64, scratch_operands = 2 : i64, tpu.core_type = #tpu.core_type<tc>, window_params = [{transform_indices = @transform_0, window_bounds = array<i64: 2, 8, 32>}, {transform_indices = @transform_1, window_bounds = array<i64: 2, 8, 32>}, {transform_indices = @transform_2, window_bounds = array<i64: 2, 32>}, {pipeline_mode = #tpu.pipeline_mode<synchronous>, transform_indices = @transform_3, window_bounds = array<i64: 32, 128>}, {pipeline_mode = #tpu.pipeline_mode<synchronous>, transform_indices = @transform_4, window_bounds = array<i64: 32, 128>}, {pipeline_mode = #tpu.pipeline_mode<synchronous>, transform_indices = @transform_5, window_bounds = array<i64: 32, 128>}, {pipeline_mode = #tpu.pipeline_mode<synchronous>, transform_indices = @transform_6, window_bounds = array<i64: 1, 128>}, {pipeline_mode = #tpu.pipeline_mode<synchronous>, transform_indices = @transform_7, window_bounds = array<i64: 128, 128>}, {pipeline_mode = #tpu.pipeline_mode<synchronous>, transform_indices = @transform_8, window_bounds = array<i64: 1, 128>}, {transform_indices = @transform_9, window_bounds = array<i64: 2, 128>}]} {
    %c0_i32 = arith.constant 0 : i32
    %0 = arith.cmpi eq, %arg1, %c0_i32 : i32
    %1 = arith.extui %0 : i1 to i32
    %c0_i32_0 = arith.constant 0 : i32
    %2 = arith.cmpi ne, %1, %c0_i32_0 : i32
    scf.if %2 {
      %cst_17 = arith.constant 0.000000e+00 : f32
      %16 = vector.broadcast %cst_17 : f32 to vector<2x32xf32>
      %c0_18 = arith.constant 0 : index
      %c0_19 = arith.constant 0 : index
      %17 = vector.load %arg12[%c0_18, %c0_19] : memref<2x32xf32, #tpu.memory_space<vmem>>, vector<2x32xf32>
      tpu.vector_store %arg12[%c0_18, %c0_19], %16 {strides = array<i32>} : memref<2x32xf32, #tpu.memory_space<vmem>>, vector<2x32xf32>,
      %cst_20 = arith.constant 0.000000e+00 : f32
      %18 = vector.broadcast %cst_20 : f32 to vector<2x32xf32>
      %c0_21 = arith.constant 0 : index
      %c0_22 = arith.constant 0 : index
      %19 = vector.load %arg13[%c0_21, %c0_22] : memref<2x32xf32, #tpu.memory_space<vmem>>, vector<2x32xf32>
      tpu.vector_store %arg13[%c0_21, %c0_22], %18 {strides = array<i32>} : memref<2x32xf32, #tpu.memory_space<vmem>>, vector<2x32xf32>,
    } else {
    }
    %c0 = arith.constant 0 : index
    %c0_1 = arith.constant 0 : index
    %3 = vector.load %arg12[%c0, %c0_1] : memref<2x32xf32, #tpu.memory_space<vmem>>, vector<2x32xf32>
    %c0_2 = arith.constant 0 : index
    %c0_3 = arith.constant 0 : index
    %c0_4 = arith.constant 0 : index
    %4 = vector.load %arg2[%c0_2, %c0_3, %c0_4] : memref<2x8x32xf32, #tpu.memory_space<vmem>>, vector<2x8x32xf32>
    %cst = arith.constant dense<0.000000e+00> : vector<2x32xf32>
    %5 = vector.multi_reduction <add>, %4, %cst [1] : vector<2x8x32xf32> to vector<2x32xf32>
    %6 = arith.addf %3, %5 : vector<2x32xf32>
    %c0_5 = arith.constant 0 : index
    %c0_6 = arith.constant 0 : index
    %7 = vector.load %arg12[%c0_5, %c0_6] : memref<2x32xf32, #tpu.memory_space<vmem>>, vector<2x32xf32>
    tpu.vector_store %arg12[%c0_5, %c0_6], %6 {strides = array<i32>} : memref<2x32xf32, #tpu.memory_space<vmem>>, vector<2x32xf32>,
    %c0_7 = arith.constant 0 : index
    %c0_8 = arith.constant 0 : index
    %8 = vector.load %arg13[%c0_7, %c0_8] : memref<2x32xf32, #tpu.memory_space<vmem>>, vector<2x32xf32>
    %c0_9 = arith.constant 0 : index
    %c0_10 = arith.constant 0 : index
    %c0_11 = arith.constant 0 : index
    %9 = vector.load %arg3[%c0_9, %c0_10, %c0_11] : memref<2x8x32xf32, #tpu.memory_space<vmem>>, vector<2x8x32xf32>
    %cst_12 = arith.constant dense<0.000000e+00> : vector<2x32xf32>
    %10 = vector.multi_reduction <add>, %9, %cst_12 [1] : vector<2x8x32xf32> to vector<2x32xf32>
    %11 = arith.addf %8, %10 : vector<2x32xf32>
    %c0_13 = arith.constant 0 : index
    %c0_14 = arith.constant 0 : index
    %12 = vector.load %arg13[%c0_13, %c0_14] : memref<2x32xf32, #tpu.memory_space<vmem>>, vector<2x32xf32>
    tpu.vector_store %arg13[%c0_13, %c0_14], %11 {strides = array<i32>} : memref<2x32xf32, #tpu.memory_space<vmem>>, vector<2x32xf32>,
    %c0_i32_15 = arith.constant 0 : i32
    %13 = arith.cmpi eq, %arg1, %c0_i32_15 : i32
    %14 = arith.extui %13 : i1 to i32
    %c0_i32_16 = arith.constant 0 : i32
    %15 = arith.cmpi ne, %14, %c0_i32_16 : i32
    scf.if %15 {
      %c0_17 = arith.constant 0 : index
      %c0_18 = arith.constant 0 : index
      %16 = vector.load %arg12[%c0_17, %c0_18] : memref<2x32xf32, #tpu.memory_space<vmem>>, vector<2x32xf32>
      %cst_19 = arith.constant 1.250000e-01 : f32
      %17 = vector.broadcast %cst_19 : f32 to vector<2x32xf32>
      %18 = arith.mulf %16, %17 : vector<2x32xf32>
      %c0_20 = arith.constant 0 : index
      %c0_21 = arith.constant 0 : index
      %19 = vector.load %arg13[%c0_20, %c0_21] : memref<2x32xf32, #tpu.memory_space<vmem>>, vector<2x32xf32>
      %cst_22 = arith.constant 1.250000e-01 : f32
      %20 = vector.broadcast %cst_22 : f32 to vector<2x32xf32>
      %21 = arith.mulf %19, %20 : vector<2x32xf32>
      %c0_23 = arith.constant 0 : index
      %c0_24 = arith.constant 0 : index
      %22 = vector.load %arg4[%c0_23, %c0_24] : memref<2x32xf32, #tpu.memory_space<vmem>>, vector<2x32xf32>
      %c0_25 = arith.constant 0 : index
      %c0_26 = arith.constant 0 : index
      %23 = vector.load %arg5[%c0_25, %c0_26] : memref<32x128xf32, #tpu.memory_space<vmem>>, vector<32x128xf32>
      %cst_27 = arith.constant dense<0.000000e+00> : vector<2x128xf32>
      %24 = tpu.matmul %18, %23, %cst_27 {dimension_numbers = #tpu.dot_dimension_numbers<[1], [0], [0], [1], [0, 0, 1, 1], [], []>} : vector<2x32xf32>, vector<32x128xf32>, vector<2x128xf32> -> vector<2x128xf32>
      %c0_28 = arith.constant 0 : index
      %c0_29 = arith.constant 0 : index
      %25 = vector.load %arg6[%c0_28, %c0_29] : memref<32x128xf32, #tpu.memory_space<vmem>>, vector<32x128xf32>
      %cst_30 = arith.constant dense<0.000000e+00> : vector<2x128xf32>
      %26 = tpu.matmul %21, %25, %cst_30 {dimension_numbers = #tpu.dot_dimension_numbers<[1], [0], [0], [1], [0, 0, 1, 1], [], []>} : vector<2x32xf32>, vector<32x128xf32>, vector<2x128xf32> -> vector<2x128xf32>
      %27 = arith.addf %24, %26 : vector<2x128xf32>
      %c0_31 = arith.constant 0 : index
      %c0_32 = arith.constant 0 : index
      %28 = vector.load %arg7[%c0_31, %c0_32] : memref<32x128xf32, #tpu.memory_space<vmem>>, vector<32x128xf32>
      %cst_33 = arith.constant dense<0.000000e+00> : vector<2x128xf32>
      %29 = tpu.matmul %22, %28, %cst_33 {dimension_numbers = #tpu.dot_dimension_numbers<[1], [0], [0], [1], [0, 0, 1, 1], [], []>} : vector<2x32xf32>, vector<32x128xf32>, vector<2x128xf32> -> vector<2x128xf32>
      %30 = arith.addf %27, %29 : vector<2x128xf32>
      %c0_34 = arith.constant 0 : index
      %c0_35 = arith.constant 0 : index
      %31 = vector.load %arg8[%c0_34, %c0_35] : memref<1x128xf32, #tpu.memory_space<vmem>>, vector<1x128xf32>
      %32 = vector.broadcast %31 : vector<1x128xf32> to vector<2x128xf32>
      %33 = arith.addf %30, %32 : vector<2x128xf32>
      %cst_36 = arith.constant 0.000000e+00 : f32
      %34 = vector.broadcast %cst_36 : f32 to vector<2x128xf32>
      %35 = arith.maximumf %33, %34 : vector<2x128xf32>
      %c0_37 = arith.constant 0 : index
      %c0_38 = arith.constant 0 : index
      %36 = vector.load %arg9[%c0_37, %c0_38] : memref<128x128xf32, #tpu.memory_space<vmem>>, vector<128x128xf32>
      %cst_39 = arith.constant dense<0.000000e+00> : vector<2x128xf32>
      %37 = tpu.matmul %35, %36, %cst_39 {dimension_numbers = #tpu.dot_dimension_numbers<[1], [0], [0], [1], [0, 0, 1, 1], [], []>} : vector<2x128xf32>, vector<128x128xf32>, vector<2x128xf32> -> vector<2x128xf32>
      %c0_40 = arith.constant 0 : index
      %c0_41 = arith.constant 0 : index
      %38 = vector.load %arg10[%c0_40, %c0_41] : memref<1x128xf32, #tpu.memory_space<vmem>>, vector<1x128xf32>
      %39 = vector.broadcast %38 : vector<1x128xf32> to vector<2x128xf32>
      %40 = arith.addf %37, %39 : vector<2x128xf32>
      %c0_42 = arith.constant 0 : index
      %c0_43 = arith.constant 0 : index
      %41 = vector.load %arg11[%c0_42, %c0_43] : memref<2x128xf32, #tpu.memory_space<vmem>>, vector<2x128xf32>
      tpu.vector_store %arg11[%c0_42, %c0_43], %40 {strides = array<i32>} : memref<2x128xf32, #tpu.memory_space<vmem>>, vector<2x128xf32>,
    } else {
    }
    return
  }
  func.func @transform_0(%arg0: i32, %arg1: i32) -> (i32, i32, i32) {
    %c0_i32 = arith.constant 0 : i32
    %c0_i32_0 = arith.constant 0 : i32
    return %arg0, %arg1, %c0_i32 : i32, i32, i32
  }
  func.func @transform_1(%arg0: i32, %arg1: i32) -> (i32, i32, i32) {
    %c0_i32 = arith.constant 0 : i32
    %c0_i32_0 = arith.constant 0 : i32
    return %arg0, %arg1, %c0_i32 : i32, i32, i32
  }
  func.func @transform_2(%arg0: i32, %arg1: i32) -> (i32, i32) {
    %c0_i32 = arith.constant 0 : i32
    %c0_i32_0 = arith.constant 0 : i32
    return %arg0, %c0_i32 : i32, i32
  }
  func.func @transform_3(%arg0: i32, %arg1: i32) -> (i32, i32) {
    %c0_i32 = arith.constant 0 : i32
    %c0_i32_0 = arith.constant 0 : i32
    %c0_i32_1 = arith.constant 0 : i32
    return %c0_i32, %c0_i32_0 : i32, i32
  }
  func.func @transform_4(%arg0: i32, %arg1: i32) -> (i32, i32) {
    %c0_i32 = arith.constant 0 : i32
    %c0_i32_0 = arith.constant 0 : i32
    %c0_i32_1 = arith.constant 0 : i32
    return %c0_i32, %c0_i32_0 : i32, i32
  }
  func.func @transform_5(%arg0: i32, %arg1: i32) -> (i32, i32) {
    %c0_i32 = arith.constant 0 : i32
    %c0_i32_0 = arith.constant 0 : i32
    %c0_i32_1 = arith.constant 0 : i32
    return %c0_i32, %c0_i32_0 : i32, i32
  }
  func.func @transform_6(%arg0: i32, %arg1: i32) -> (i32, i32) {
    %c0_i32 = arith.constant 0 : i32
    %c0_i32_0 = arith.constant 0 : i32
    %c0_i32_1 = arith.constant 0 : i32
    return %c0_i32, %c0_i32_0 : i32, i32
  }
  func.func @transform_7(%arg0: i32, %arg1: i32) -> (i32, i32) {
    %c0_i32 = arith.constant 0 : i32
    %c0_i32_0 = arith.constant 0 : i32
    %c0_i32_1 = arith.constant 0 : i32
    return %c0_i32, %c0_i32_0 : i32, i32
  }
  func.func @transform_8(%arg0: i32, %arg1: i32) -> (i32, i32) {
    %c0_i32 = arith.constant 0 : i32
    %c0_i32_0 = arith.constant 0 : i32
    %c0_i32_1 = arith.constant 0 : i32
    return %c0_i32, %c0_i32_0 : i32, i32
  }
  func.func @transform_9(%arg0: i32, %arg1: i32) -> (i32, i32) {
    %c0_i32 = arith.constant 0 : i32
    %c0_i32_0 = arith.constant 0 : i32
    return %arg0, %c0_i32 : i32, i32
  }
}

</mosaic_0001>

<bundles_post_ra>
// kernel: tpu_custom_call.1
= control target key start
LH: loop header
LB: loop body
LE: loop exit
PB: predicated region body
PF: predicated region fallthrough
CT: control target
= control target key end

     0   :  { %14 = vsyncpa [#allocation5], 0  ;;  %s691_s0 = inlined_call_operand.hbm [shape: f32[2,8,32], index: 0, kind: input, shape index: {}]   ;;  %s692_s1 = inlined_call_operand.hbm [shape: f32[2,8,32], index: 1, kind: input, shape index: {}]   ;;  %s693_s2 = inlined_call_operand.hbm [shape: f32[2,32], index: 2, kind: input, shape index: {}]   ;;  %s694_s3 = inlined_call_operand.hbm [shape: f32[32,128], index: 3, kind: input, shape index: {}]   ;;  %s695_s4 = inlined_call_operand.hbm [shape: f32[32,128], index: 4, kind: input, shape index: {}]   ;;  %s696_s5 = inlined_call_operand.hbm [shape: f32[32,128], index: 5, kind: input, shape index: {}]   ;;  %s697_s6 = inlined_call_operand.vmem [shape: f32[1,128], index: 6, kind: input, shape index: {}]   ;;  %s698_s7 = inlined_call_operand.hbm [shape: f32[128,128], index: 7, kind: input, shape index: {}]   ;;  %s699_s8 = inlined_call_operand.vmem [shape: f32[1,128], index: 8, kind: input, shape index: {}]   ;;  %s700_s9 = inlined_call_operand.hbm [shape: f32[2,128], index: 9, kind: output, shape index: {}]  }
   0x1   :  { %15 = vsyncpa [#allocation8], 0 }
   0x2   :  { %16 = vsyncpa [#allocation11], 0 }
   0x3   :  { %17 = vsyncpa [#allocation14], 0 }
   0x4   :  { %18 = vsyncpa [#allocation6], 0  ;;  %s36_s11 = sshll.u32 %s692_s1, 4  ;;  %s571_s12 = smov [#allocation7]   ;;  %s37_s11 = int_to_ptr.hbm [resolvable:$true] %s36_s11 }
   0x5   :  { %s38_s13 = sshll.u32 %s571_s12, 4  ;;  %s60_s16 = sshll.u32 %s694_s3, 4  ;;  %s39_s13 = int_to_ptr.vmem [resolvable:$true] %s38_s13  ;;  %s61_s16 = int_to_ptr.hbm [resolvable:$true] %s60_s16 }
   0x6   :  { %s572_s17 = smov 128   ;;  %s573_s18 = smov 8  }
   0x7   :  { %44 = dma.hbm_to_vmem [thread:$0]  %s37_s11, 256, %s39_s13, [#allocation8], %s572_s17, %s572_s17, %s573_s18  }
   0x8   :  { %s574_s19 = smov [#allocation10]   ;;  %s86_s1 = sshll.u32 %s696_s5, 4  ;;  %s87_s1 = int_to_ptr.hbm [resolvable:$true] %s86_s1 }
   0x9   :  { %s62_s20 = sshll.u32 %s574_s19, 4  ;;  %s23_s24 = sshll.u32 %s691_s0, 4  ;;  %s63_s20 = int_to_ptr.vmem [resolvable:$true] %s62_s20  ;;  %s24_s24 = int_to_ptr.hbm [resolvable:$true] %s23_s24 }
   0xa   :  { %68 = dma.hbm_to_vmem [thread:$0]  %s61_s16, 512, %s63_s20, [#allocation11], %s572_s17, %s572_s17, %s573_s18  }
   0xb   :  { %s575_s25 = smov [#allocation13]   ;;  %s576_s27 = smov [#allocation4]  }
   0xc   :  { %s88_s26 = sshll.u32 %s575_s25, 4  ;;  %s25_s5 = sshll.u32 %s576_s27, 4  ;;  %s89_s26 = int_to_ptr.vmem [resolvable:$true] %s88_s26  ;;  %s26_s5 = int_to_ptr.vmem [resolvable:$true] %s25_s5 }
   0xd   :  { %94 = dma.hbm_to_vmem [thread:$0]  %s87_s1, 512, %s89_s26, [#allocation14], %s572_s17, %s572_s17, %s573_s18  }
   0xe   :  { %s50_s30 = sshll.u32 %s693_s2, 4  ;;  %s73_s11 = sshll.u32 %s695_s4, 4  ;;  %s51_s30 = int_to_ptr.hbm [resolvable:$true] %s50_s30  ;;  %s74_s11 = int_to_ptr.hbm [resolvable:$true] %s73_s11 }
   0xf   :  { %31 = dma.hbm_to_vmem [thread:$0]  %s24_s24, 256, %s26_s5, [#allocation5], %s572_s17, %s572_s17, %s573_s18  }
  0x10   :  { %s577_s12 = smov [#allocation9]   ;;  %s578_s14 = smov [#allocation12]  }
  0x11   :  { %s52_s13 = sshll.u32 %s577_s12, 4  ;;  %s75_s15 = sshll.u32 %s578_s14, 4  ;;  %s53_s13 = int_to_ptr.vmem [resolvable:$true] %s52_s13  ;;  %s76_s15 = int_to_ptr.vmem [resolvable:$true] %s75_s15 }
  0x12   :  { %55 = dma.hbm_to_vmem [thread:$0]  %s51_s30, 32, %s53_s13, [#allocation8]  }
  0x13   :  { %s101_s2 = sshll.u32 %s698_s7, 4  ;;  %s579_s20 = smov [#allocation15]   ;;  %s102_s2 = int_to_ptr.hbm [resolvable:$true] %s101_s2 }
  0x14   :  { %81 = dma.hbm_to_vmem [thread:$0]  %s74_s11, 512, %s76_s15, [#allocation11], %s572_s17, %s572_s17, %s573_s18  }
  0x15   :  { %s103_s21 = sshll.u32 %s579_s20, 4  ;;  %s104_s21 = int_to_ptr.vmem [resolvable:$true] %s103_s21 }
  0x16   :  { %109 = dma.hbm_to_vmem [thread:$0]  %s102_s2, 2048, %s104_s21, [#allocation14], %s572_s17, %s572_s17, %s573_s18  }
  0x17   :  { %561 = dma.done.wait [#allocation5], 256  }
  0x18   :  { %562 = vsyncadd [#allocation5], 4294967040 }
  0x19   :  { %563 = dma.done.wait [#allocation8], 288  }
  0x1a   :  { %564 = vsyncadd [#allocation8], 4294967008 }
  0x1b   :  { %565 = dma.done.wait [#allocation11], 1024  }
  0x1c   :  { %566 = vsyncadd [#allocation11], 4294966272 }
  0x1d   :  { %567 = dma.done.wait [#allocation14], 2560  }
  0x1e   :  { %568 = vsyncadd [#allocation14], 4294964736  ;;  %vm144_vm0 = vcmask 254976   ;;  %v580_v0 = vmov 0.0   ;;  %v261_v1 = vld [vmem:[#allocation13 + $0x18] sm:$0xff]  ;;  %v260_v2 = vld [vmem:[#allocation13 + $0x10] sm:$0xff] }
  0x1f   :  { %145 = vst.msk [vmem:[#allocation2] sm:$0x3] %vm144_vm0, %v580_v0  ;;  %v211_v3 = vld [vmem:[#allocation12 + $0x18] sm:$0xff]  ;;  %277 = vmatpush.msra.mxu2 %v261_v1  ;;  %v210_v5 = vld [vmem:[#allocation12 + $0x10] sm:$0xff]  ;;  %vm150_vm1 = vcmask 261120   ;;  %v259_v6 = vld [vmem:[#allocation13 + $0x8] sm:$0xff] }
  0x20   :  { %146 = vst.msk [vmem:[#allocation3] sm:$0x3] %vm144_vm0, %v580_v0  ;;  %227 = vmatpush.msra.mxu0 %v211_v3  ;;  %v207_v4 = vld [vmem:[#allocation10 + $0x18] sm:$0xff]  ;;  %v206_v7 = vld [vmem:[#allocation10 + $0x10] sm:$0xff]  ;;  %v258_v8 = vld [vmem:[#allocation13] sm:$0xff]  ;;  %vm167_vm2 = vcmask 1041409  }
  0x21   :  { %250 = vmatpush.msra.mxu1 %v207_v4  ;;  %278 = vmatpush.msra.mxu2 %v260_v2  ;;  %v148_v9 = vld [vmem:[#allocation4] sm:$0xff]  ;;  %v149_v10 = vld [vmem:[#allocation4 + $0x8] sm:$0xff]  ;;  %v174_v13 = vld [vmem:[#allocation7] sm:$0xff]  ;;  %s581_s22 = smov [#allocation16]   ;;  %s340_s24 = sshll.u32 %s700_s9, 4  ;;  %s341_s24 = int_to_ptr.hbm [resolvable:$true] %s340_s24 }
  0x22   :  { %228 = vmatpush.msra.mxu0 %v210_v5  ;;  %v151_v11 = vsel %vm150_vm1, %v148_v9, 0.0  ;;  %v158_v12 = vsel %vm150_vm1, %v149_v10, 0.0  ;;  %v175_v14 = vld [vmem:[#allocation7 + $0x8] sm:$0xff]  ;;  %v203_v15 = vld [vmem:[#allocation9] sm:$0x3]  ;;  %v176_v18 = vsel %vm150_vm1, %v174_v13, 0.0 }
  0x23   :  { %251 = vmatpush.msra.mxu1 %v206_v7  ;;  %279 = vmatpush.msra.mxu2 %v259_v6  ;;  %v152_v16 = vrot.slane %v151_v11, 4  ;;  %v159_v17 = vrot.slane %v158_v12, 4  ;;  %v183_v19 = vsel %vm150_vm1, %v175_v14, 0.0  ;;  %v209_v20 = vld [vmem:[#allocation12 + $0x8] sm:$0xff]  ;;  %v177_v22 = vrot.slane %v176_v18, 4  ;;  %v208_v24 = vld [vmem:[#allocation12] sm:$0xff] }
  0x24   :  { %v205_v21 = vld [vmem:[#allocation10 + $0x8] sm:$0xff]  ;;  %v184_v23 = vrot.slane %v183_v19, 4  ;;  %229 = vmatpush.msra.mxu0 %v209_v20  ;;  %v204_v25 = vld [vmem:[#allocation10] sm:$0xff]  ;;  %v307_v26 = vld [vmem:[#allocation15 + $0x78] sm:$0xff]  ;;  %s338_s1 = sshll.u32 %s581_s22, 4  ;;  %s339_s1 = int_to_ptr.vmem [resolvable:$true] %s338_s1 }
  0x25   :  { %252 = vmatpush.msra.mxu1 %v205_v21  ;;  %280 = vmatpush.msra.mxu2 %v258_v8  ;;  %v153_v27 = vadd.f32 %v152_v16, %v151_v11  ;;  %v160_v28 = vadd.f32 %v159_v17, %v158_v12  ;;  %v306_v29 = vld [vmem:[#allocation15 + $0x70] sm:$0xff]  ;;  %v178_v30 = vadd.f32 %v177_v22, %v176_v18  ;;  %v305_v32 = vld [vmem:[#allocation15 + $0x68] sm:$0xff]  ;;  %v304_v37 = vld [vmem:[#allocation15 + $0x60] sm:$0xff] }
  0x26   :  { %312 = vmatpush.msra.mxu3 %v307_v26  ;;  %v185_v31 = vadd.f32 %v184_v23, %v183_v19  ;;  %355 = vmatmul.msk.f32.vlgmr.msra.gmra.mxu2 %vm150_vm1, %v203_v15  ;;  %v303_v42 = vld [vmem:[#allocation15 + $0x58] sm:$0xff]  ;;  %v302_v47 = vld [vmem:[#allocation15 + $0x50] sm:$0xff]  ;;  %v301_v54 = vld [vmem:[#allocation15 + $0x48] sm:$0xff] }
  0x27   :  { %230 = vmatpush.msra.mxu0 %v208_v24  ;;  %v154_v33 = vrot.slane %v153_v27, 2  ;;  %v161_v34 = vrot.slane %v160_v28, 2  ;;  %253 = vmatpush.msra.mxu1 %v204_v25  ;;  %v179_v35 = vrot.slane %v178_v30, 2  ;;  %v147_v48 = vld [vmem:[#allocation2] sm:$0x3]  ;;  %v300_v58 = vld [vmem:[#allocation15 + $0x40] sm:$0xff] }
  0x28   :  { %313 = vmatpush.msra.mxu3 %v306_v29  ;;  %v186_v36 = vrot.slane %v185_v31, 2  ;;  %v173_v51 = vld [vmem:[#allocation3] sm:$0x3]  ;;  %v298_v61 = vld [vmem:[#allocation15 + $0x30] sm:$0xff]  ;;  %v297_v62 = vld [vmem:[#allocation15 + $0x28] sm:$0xff] }
  0x29   :  { %v155_v38 = vadd.f32 %v154_v33, %v153_v27  ;;  %v162_v39 = vadd.f32 %v161_v34, %v160_v28  ;;  %v180_v40 = vadd.f32 %v179_v35, %v178_v30  ;;  %v299_v60 = vld [vmem:[#allocation15 + $0x38] sm:$0xff]  ;;  %v296_v3 = vld [vmem:[#allocation15 + $0x20] sm:$0xff]  ;;  %v294_v5 = vld [vmem:[#allocation15 + $0x10] sm:$0xff] }
  0x2a   :  { %314 = vmatpush.msra.mxu3 %v305_v32  ;;  %v187_v41 = vadd.f32 %v186_v36, %v185_v31  ;;  %v295_v4 = vld [vmem:[#allocation15 + $0x18] sm:$0xff]  ;;  %v293_v6 = vld [vmem:[#allocation15 + $0x8] sm:$0xff]  ;;  %v292_v7 = vld [vmem:[#allocation15] sm:$0xff] }
  0x2b   :  { %v156_v43 = vrot.slane %v155_v38, 1  ;;  %v163_v44 = vrot.slane %v162_v39, 1  ;;  %v181_v45 = vrot.slane %v180_v40, 1  ;;  %v367_v12 = vld [vmem:[%s697_s6] ss:$0 sm:$0xff] }
  0x2c   :  { %315 = vmatpush.msra.mxu3 %v304_v37  ;;  %v188_v46 = vrot.slane %v187_v41, 1  ;;  %v368_v16 = vld [vmem:[%s699_s8] ss:$0 sm:$0xff] }
  0x2d   :  { %v157_v49 = vadd.f32 %v156_v43, %v155_v38  ;;  %v164_v50 = vadd.f32 %v163_v44, %v162_v39  ;;  %v182_v52 = vadd.f32 %v181_v45, %v180_v40 }
  0x2e   :  { %316 = vmatpush.msra.mxu3 %v303_v42  ;;  %v189_v53 = vadd.f32 %v188_v46, %v187_v41 }
  0x2f   :  { %v168_v55 = vsel %vm167_vm2, %v164_v50, %v157_v49 }
  0x30   :  { %317 = vmatpush.msra.mxu3 %v302_v47  ;;  %v170_v56 = vadd.f32 %v168_v55, %v147_v48  ;;  %v192_v57 = vsel %vm167_vm2, %v189_v53, %v182_v52 }
  0x31   :  { %v194_v59 = vadd.f32 %v192_v57, %v173_v51 }
  0x32   :  { %318 = vmatpush.msra.mxu3 %v301_v54  ;;  %172 = vst.msk [vmem:[#allocation2] sm:$0x3] %vm144_vm0, %v170_v56 }
  0x33   :  { %195 = vst.msk [vmem:[#allocation3] sm:$0x3] %vm144_vm0, %v194_v59 }
  0x34   :  { %319 = vmatpush.msra.mxu3 %v300_v58 }
  0x36   :  { %320 = vmatpush.msra.mxu3 %v299_v60 }
  0x38   :  { %321 = vmatpush.msra.mxu3 %v298_v61 }
  0x39   :  { %v199_v63 = vld [vmem:[#allocation2] sm:$0x3] }
  0x3a   :  { %322 = vmatpush.msra.mxu3 %v297_v62  ;;  %v201_v0 = vld [vmem:[#allocation3] sm:$0x3]  ;;  %v200_v1 = vmul.f32 0.125, %v199_v63 }
  0x3b   :  { %v202_v2 = vmul.f32 0.125, %v201_v0 }
  0x3c   :  { %354 = vmatmul.msk.f32.vlgmr.msra.gmra.mxu1 %vm150_vm1, %v200_v1  ;;  %323 = vmatpush.msra.mxu3 %v296_v3 }
  0x3d   :  { %353 = vmatmul.msk.f32.vlgmr.msra.gmra.mxu0 %vm150_vm1, %v202_v2 }
  0x3e   :  { %324 = vmatpush.msra.mxu3 %v295_v4 }
  0x40   :  { %325 = vmatpush.msra.mxu3 %v294_v5 }
  0x42   :  { %326 = vmatpush.msra.mxu3 %v293_v6 }
  0x44   :  { %327 = vmatpush.msra.mxu3 %v292_v7 }
  0xa9   :  { %v282_v10 = vpop.f32.mrf.mxu2 }
  0xb9   :  { %v255_v8 = vpop.f32.mrf.mxu1 }
  0xba   :  { %v232_v9 = vpop.f32.mrf.mxu0 }
  0xbb   :  { %v256_v11 = vadd.f32 %v255_v8, %v232_v9 }
  0xbd   :  { %v285_v13 = vadd.f32 %v282_v10, %v256_v11 }
  0xbf   :  { %v290_v14 = vadd.f32 %v367_v12, %v285_v13 }
  0xc1   :  { %v291_v15 = vmax.f32 %v290_v14, 0.0 }
  0xc3   :  { %328 = vmatmul.f32.vlgmr.msra.gmra.mxu3 %v291_v15 }
 0x146   :  { %v329_v17 = vpop.f32.mrf.mxu3 }
 0x147   :  { %v330_v18 = vadd.f32 %v368_v16, %v329_v17 }
 0x149   :  { %332 = vst [vmem:[#allocation16] sm:$0x3] %v330_v18 }
 0x14a   :  { %343 = dma.vmem_to_hbm [thread:$0]  %s339_s1, 32, %s341_s24, [#allocation6]  }
 0x14b   :  { %569 = dma.done.wait [#allocation6], 32  }
 0x14c   :  { %570 = vsyncadd [#allocation6], 4294967264 }
 0x14d   :  { %348 = vsyncpa [#allocation5], 1 }
 0x14e   :  { %349 = vsyncpa [#allocation8], 1 }
 0x14f   :  { %350 = vsyncpa [#allocation11], 1 }
 0x150   :  { %351 = vsyncpa [#allocation14], 1 }
 0x151   :  { %352 = vsyncpa [#allocation6], 1 }

</bundles_post_ra>
